<compile_context>
chip_gen: v6e
topology: v6e:2x2x1
jax: 0.10.0
libtpu: 0.0.40
codegen_flags: <defaults>
</compile_context>

<pallas_src>
import functools

import jax
import jax.numpy as jnp
from jax.experimental import pallas as pl
from jax.experimental.pallas import tpu as pltpu

_TARGET_TILE_BYTES = 1 << 20   # ~1 MiB per stream buffer


def _quant_kernel(x_ref, ori_ref, q_ref, *, half_wave, r, scale, inv_scale):
    """Elementwise quantization on a (tile_rows, lanes) f32 block."""
    x = x_ref[...]

    if half_wave == 'A':
        # 0.5*(|x| - |x - r| + r) == clamp(x, 0, r); abs form kept for exact parity.
        ori = 0.5 * (jnp.abs(x) - jnp.abs(x - r) + r)
    else:  # 'Q'   (lw_1 == rw_1 == r, exactly as in the PyTorch module)
        ori = 0.5 * (jnp.abs(-x + r) - jnp.abs(x - r) + (r + r))

    # round(ori / b) * b  with 1/b precomputed -> single multiply, no divide.
    q = jnp.round(ori * inv_scale) * scale

    ori_ref[...] = ori.astype(ori_ref.dtype)
    q_ref[...] = q.astype(q_ref.dtype)


def _layout_2d(B, N, C):
    """Free (bitcast) 2-D reshape (rows, lanes) of the flat contiguous tensor.

    Prefer a lane-dense last dim (multiple of 128) so stores are unmasked
    full-width vst; otherwise fall back to the natural (B*N, C) layout
    (blocks span the full C, so HBM DMAs stay contiguous)."""
    total = B * N * C
    for lanes in (512, 256, 128):
        if total % lanes == 0:
            return total // lanes, lanes
    return B * N, C


def _tile_rows(rows, lanes):
    """Row-tile size: full extent if small, else ~1 MiB tiles (multiple of 8)."""
    max_rows = max(8, (_TARGET_TILE_BYTES // (lanes * 4)) // 8 * 8)
    if rows <= max_rows:
        return rows          # one full-extent tile (any row count is legal)
    return max_rows          # multiple of 8; ragged last block masked by Pallas


def quant_forward(inputs, half_wave, a_bit, range_val=6.0):
    """Pallas equivalent of Quant.forward. Returns (ori_x, x_quantized)."""
    assert half_wave in ('A', 'Q')
    B, N, C = inputs.shape
    inputs = inputs.astype(jnp.float32)

    # Host-side short circuit (range is a host-static Python float here).
    if range_val == 0:
        z = jnp.zeros((B, N, C), dtype=jnp.float32)
        return z, z

    r = float(range_val)
    denom = 2.0 ** a_bit - 1.0
    scale = r / denom
    inv_scale = denom / r

    rows, lanes = _layout_2d(B, N, C)
    x2d = inputs.reshape(rows, lanes)       # contiguous -> free reshape, no copy

    tr = _tile_rows(rows, lanes)
    grid = (pl.cdiv(rows, tr),)
    block = pl.BlockSpec((tr, lanes), lambda i: (i, 0))

    kernel = functools.partial(
        _quant_kernel, half_wave=half_wave, r=r, scale=scale, inv_scale=inv_scale)

    ori2d, q2d = pl.pallas_call(
        kernel,
        out_shape=(
            jax.ShapeDtypeStruct((rows, lanes), jnp.float32),
            jax.ShapeDtypeStruct((rows, lanes), jnp.float32),
        ),
        grid=grid,
        in_specs=[block],
        out_specs=(block, block),
        compiler_params=pltpu.CompilerParams(
            dimension_semantics=("parallel",)),
    )(x2d)

    return ori2d.reshape(B, N, C), q2d.reshape(B, N, C)


if __name__ == "__main__":
    key = jax.random.PRNGKey(0)

    # Small shape consistent with the module: (B, N, C) with C = 192.
    B, N, C = 2, 8, 192
    x = jax.random.normal(key, (B, N, C), dtype=jnp.float32) * 4.0

    # half-wave 'A' path, 4-bit quantization (lanes=512, single tile)
    ori_a, q_a = quant_forward(x, half_wave='A', a_bit=4, range_val=6.0)
    # half-wave 'Q' path
    ori_q, q_q = quant_forward(x, half_wave='Q', a_bit=4, range_val=6.0)
    # range == 0 path
    z0, z1 = quant_forward(x, half_wave='A', a_bit=4, range_val=0.0)

    # ViT-ish shape: lanes=256, single full-extent tile (591, 256).
    x2 = jax.random.normal(jax.random.PRNGKey(1), (4, 197, 192), jnp.float32) * 4.0
    ori_b, q_b = quant_forward(x2, half_wave='A', a_bit=8, range_val=6.0)

    # Larger row count: lanes=512, rows=591 -> grid=2 with a ragged last block.
    x3 = jax.random.normal(jax.random.PRNGKey(2), (8, 197, 192), jnp.float32) * 4.0
    ori_c, q_c = quant_forward(x3, half_wave='A', a_bit=4, range_val=6.0)

    # Awkward element count (not divisible by 128): natural-layout fallback (15, 100).
    x4 = jax.random.normal(jax.random.PRNGKey(3), (3, 5, 100), jnp.float32) * 4.0
    ori_d, q_d = quant_forward(x4, half_wave='A', a_bit=4, range_val=6.0)

    jax.block_until_ready((ori_a, q_a, ori_q, q_q, z0, z1,
                           ori_b, q_b, ori_c, q_c, ori_d, q_d))

    # ---- pure-JAX references ------------------------------------------------
    def ref(xv, half_wave, a_bit, r):
        s = r / (2.0 ** a_bit - 1.0)
        if half_wave == 'A':
            o = 0.5 * (jnp.abs(xv) - jnp.abs(xv - r) + r)
        else:
            o = 0.5 * (jnp.abs(-xv + r) - jnp.abs(xv - r) + 2.0 * r)
        return o, jnp.round(o / s) * s

    ro, rq = ref(x, 'A', 4, 6.0)
    assert jnp.allclose(ori_a, ro, atol=1e-5) and jnp.allclose(q_a, rq, atol=1e-5)
    ro, rq = ref(x, 'Q', 4, 6.0)
    assert jnp.allclose(ori_q, ro, atol=1e-5) and jnp.allclose(q_q, rq, atol=1e-5)
    ro, rq = ref(x2, 'A', 8, 6.0)
    assert jnp.allclose(ori_b, ro, atol=1e-5) and jnp.allclose(q_b, rq, atol=1e-5)
    ro, rq = ref(x3, 'A', 4, 6.0)
    assert jnp.allclose(ori_c, ro, atol=1e-5) and jnp.allclose(q_c, rq, atol=1e-5)
    ro, rq = ref(x4, 'A', 4, 6.0)
    assert jnp.allclose(ori_d, ro, atol=1e-5) and jnp.allclose(q_d, rq, atol=1e-5)
    assert jnp.allclose(z0, 0.0) and jnp.allclose(z1, 0.0)

    print("KERNEL_OK")
</pallas_src>

<mosaic_0001>
module attributes {stable_mosaic.version = 11 : i64} {
  func.func @_quant_kernel(%arg0: i32, %arg1: memref<6x512xf32, #tpu.memory_space<vmem>>, %arg2: memref<6x512xf32, #tpu.memory_space<vmem>>, %arg3: memref<6x512xf32, #tpu.memory_space<vmem>>) attributes {dimension_semantics = [#tpu.dimension_semantics<parallel>], iteration_bounds = array<i64: 1>, scalar_prefetch = 0 : i64, scratch_operands = 0 : i64, tpu.core_type = #tpu.core_type<tc>, window_params = [{transform_indices = @transform_0, window_bounds = array<i64: 6, 512>}, {transform_indices = @transform_1, window_bounds = array<i64: 6, 512>}, {transform_indices = @transform_2, window_bounds = array<i64: 6, 512>}]} {
    %c0 = arith.constant 0 : index
    %c0_0 = arith.constant 0 : index
    %0 = vector.load %arg1[%c0, %c0_0] : memref<6x512xf32, #tpu.memory_space<vmem>>, vector<6x512xf32>
    %1 = math.absf %0 : vector<6x512xf32>
    %cst = arith.constant 6.000000e+00 : f32
    %2 = vector.broadcast %cst : f32 to vector<6x512xf32>
    %3 = arith.subf %0, %2 : vector<6x512xf32>
    %4 = math.absf %3 : vector<6x512xf32>
    %5 = arith.subf %1, %4 : vector<6x512xf32>
    %cst_1 = arith.constant 6.000000e+00 : f32
    %6 = vector.broadcast %cst_1 : f32 to vector<6x512xf32>
    %7 = arith.addf %5, %6 : vector<6x512xf32>
    %cst_2 = arith.constant 5.000000e-01 : f32
    %8 = vector.broadcast %cst_2 : f32 to vector<6x512xf32>
    %9 = arith.mulf %8, %7 : vector<6x512xf32>
    %cst_3 = arith.constant 2.500000e+00 : f32
    %10 = vector.broadcast %cst_3 : f32 to vector<6x512xf32>
    %11 = arith.mulf %9, %10 : vector<6x512xf32>
    %12 = math.roundeven %11 : vector<6x512xf32>
    %cst_4 = arith.constant 4.000000e-01 : f32
    %13 = vector.broadcast %cst_4 : f32 to vector<6x512xf32>
    %14 = arith.mulf %12, %13 : vector<6x512xf32>
    %c0_5 = arith.constant 0 : index
    %c0_6 = arith.constant 0 : index
    %15 = vector.load %arg2[%c0_5, %c0_6] : memref<6x512xf32, #tpu.memory_space<vmem>>, vector<6x512xf32>
    tpu.vector_store %arg2[%c0_5, %c0_6], %9 {strides = array<i32>} : memref<6x512xf32, #tpu.memory_space<vmem>>, vector<6x512xf32>,
    %c0_7 = arith.constant 0 : index
    %c0_8 = arith.constant 0 : index
    %16 = vector.load %arg3[%c0_7, %c0_8] : memref<6x512xf32, #tpu.memory_space<vmem>>, vector<6x512xf32>
    tpu.vector_store %arg3[%c0_7, %c0_8], %14 {strides = array<i32>} : memref<6x512xf32, #tpu.memory_space<vmem>>, vector<6x512xf32>,
    return
  }
  func.func @transform_0(%arg0: i32) -> (i32, i32) {
    %c0_i32 = arith.constant 0 : i32
    %c0_i32_0 = arith.constant 0 : i32
    return %arg0, %c0_i32 : i32, i32
  }
  func.func @transform_1(%arg0: i32) -> (i32, i32) {
    %c0_i32 = arith.constant 0 : i32
    %c0_i32_0 = arith.constant 0 : i32
    return %arg0, %c0_i32 : i32, i32
  }
  func.func @transform_2(%arg0: i32) -> (i32, i32) {
    %c0_i32 = arith.constant 0 : i32
    %c0_i32_0 = arith.constant 0 : i32
    return %arg0, %c0_i32 : i32, i32
  }
}

</mosaic_0001>

<bundles_post_ra>
// kernel: tpu_custom_call.1
= control target key start
LH: loop header
LB: loop body
LE: loop exit
PB: predicated region body
PF: predicated region fallthrough
CT: control target
= control target key end

     0   :  { %8 = vsyncpa [#allocation3], 0  ;;  %s233_s0 = inlined_call_operand.hbm [shape: f32[6,512], index: 0, kind: input, shape index: {}]   ;;  %s234_s1 = inlined_call_operand.hbm [shape: f32[6,512], index: 1, kind: output, shape index: {0}]   ;;  %s235_s2 = inlined_call_operand.hbm [shape: f32[6,512], index: 2, kind: output, shape index: {1}]  }
   0x1   :  { %9 = vsyncpa [#allocation4], 0 }
   0x2   :  { %10 = vsyncpa [#allocation7], 0  ;;  %s206_s9 = smov [#allocation2]  }
   0x3   :  { %s17_s10 = sshll.u32 %s206_s9, 4  ;;  %s18_s10 = int_to_ptr.vmem [resolvable:$true] %s17_s10 }
   0x4   :  { %s148_s11 = scalar_lea.vmem %s18_s10, 512  ;;  %p153_p1 = scmp.lt.s32.totalorder %s18_s10, %s18_s10 }
   0x5   :  { %p149_p0 = scmp.ne.s32.totalorder %s18_s10, %s148_s11  ;;  %p154_p2 = scmp.lt.s32.totalorder %s148_s11, %s148_s11 }
   0x7   :  { %p155_p3 = por %p154_p2, %p153_p1 }
   0x9   :  { %p156_p4 = pnand %p155_p3, %p149_p0 }
   0xb   :  { %159 = shalt.err (!%p156_p4)
}
   0xc   :  { %20 = dma.hbm_to_vmem [thread:$0]  %s233_s0, 512, %s18_s10, [#allocation3]  }
   0xd   :  { %200 = dma.done.wait [#allocation3], 512  }
   0xe   :  { %201 = vsyncadd [#allocation3], 4294966784  ;;  %v24_v0 = vld [vmem:[#allocation2] sm:$0x3f]  ;;  %v25_v1 = vld [vmem:[#allocation2 + $0x8] sm:$0x3f] }
   0xf   :  { %v26_v2 = vld [vmem:[#allocation2 + $0x10] sm:$0x3f]  ;;  %v28_v3 = vand.u32 2147483647, %v24_v0  ;;  %v101_v4 = vadd.f32 -6.0, %v24_v0  ;;  %v102_v6 = vadd.f32 -6.0, %v25_v1 }
  0x10   :  { %v29_v5 = vand.u32 2147483647, %v25_v1  ;;  %v30_v7 = vand.u32 2147483647, %v26_v2  ;;  %v103_v8 = vadd.f32 -6.0, %v26_v2  ;;  %s207_s0 = smov [#allocation5]  }
  0x11   :  { %v27_v9 = vld [vmem:[#allocation2 + $0x18] sm:$0x3f]  ;;  %v36_v10 = vand.u32 2147483647, %v101_v4  ;;  %v37_v11 = vand.u32 2147483647, %v102_v6 }
  0x12   :  { %v38_v12 = vand.u32 2147483647, %v103_v8  ;;  %v31_v13 = vand.u32 2147483647, %v27_v9  ;;  %v104_v14 = vadd.f32 -6.0, %v27_v9  ;;  %s78_s14 = sshll.u32 %s207_s0, 4  ;;  %s79_s14 = int_to_ptr.vmem [resolvable:$true] %s78_s14 }
  0x13   :  { %v40_v15 = vsub.f32 %v28_v3, %v36_v10  ;;  %v41_v16 = vsub.f32 %v29_v5, %v37_v11  ;;  %s160_s15 = scalar_lea.vmem %s79_s14, 512  ;;  %p165_p6 = scmp.lt.s32.totalorder %s79_s14, %s79_s14 }
  0x14   :  { %v42_v17 = vsub.f32 %v30_v7, %v38_v12  ;;  %v39_v18 = vand.u32 2147483647, %v104_v14  ;;  %p161_p5 = scmp.ne.s32.totalorder %s79_s14, %s160_s15  ;;  %p166_p7 = scmp.lt.s32.totalorder %s160_s15, %s160_s15 }
  0x15   :  { %v44_v19 = vadd.f32 6.0, %v40_v15  ;;  %v45_v20 = vadd.f32 6.0, %v41_v16 }
  0x16   :  { %v46_v21 = vadd.f32 6.0, %v42_v17  ;;  %v43_v22 = vsub.f32 %v31_v13, %v39_v18  ;;  %p167_p8 = por %p166_p7, %p165_p6 }
  0x17   :  { %v48_v23 = vmul.f32 0.5, %v44_v19  ;;  %v49_v24 = vmul.f32 0.5, %v45_v20 }
  0x18   :  { %v50_v25 = vmul.f32 0.5, %v46_v21  ;;  %v47_v26 = vadd.f32 6.0, %v43_v22  ;;  %p168_p9 = pnand %p167_p8, %p161_p5 }
  0x19   :  { %v52_v27 = vmul.f32 2.5, %v48_v23  ;;  %64 = vst [vmem:[#allocation5] sm:$0x3f] %v48_v23  ;;  %v53_v28 = vmul.f32 2.5, %v49_v24  ;;  %65 = vst [vmem:[#allocation5 + $0x8] sm:$0x3f] %v49_v24 }
  0x1a   :  { %v54_v29 = vmul.f32 2.5, %v50_v25  ;;  %66 = vst [vmem:[#allocation5 + $0x10] sm:$0x3f] %v50_v25  ;;  %v51_v30 = vmul.f32 0.5, %v47_v26 }
  0x1b   :  { %v107_v31 = vcvt.f32.s32 %v52_v27  ;;  %v105_v33 = vand.u32 2147483647, %v52_v27  ;;  %v113_v34 = vand.u32 2147483647, %v53_v28  ;;  %v115_v35 = vcvt.f32.s32 %v53_v28 }
  0x1c   :  { %v55_v32 = vmul.f32 2.5, %v51_v30  ;;  %67 = vst [vmem:[#allocation5 + $0x18] sm:$0x3f] %v51_v30  ;;  %v110_v37 = vand.u32 2147483648, %v52_v27  ;;  %v123_v38 = vcvt.f32.s32 %v54_v29 }
  0x1d   :  { %v108_v36 = vcvt.s32.f32 %v107_v31 }
  0x1e   :  { %171 = shalt.err (!%p168_p9)
}
  0x1f   :  { %81 = dma.vmem_to_hbm [thread:$0]  %s79_s14, 512, %s234_s1, [#allocation4]   ;;  %v116_v39 = vcvt.s32.f32 %v115_v35  ;;  %v118_v40 = vand.u32 2147483648, %v53_v28  ;;  %v121_v41 = vand.u32 2147483647, %v54_v29  ;;  %v124_v43 = vcvt.s32.f32 %v123_v38 }
  0x20   :  { %v109_v42 = vand.u32 2147483647, %v108_v36  ;;  %v126_v44 = vand.u32 2147483648, %v54_v29  ;;  %v131_v45 = vcvt.f32.s32 %v55_v32  ;;  %vm106_vm0 = vcmp.lt.f32.partialorder %v105_v33, 8388608.0  ;;  %s208_s1 = smov [#allocation6]  }
  0x21   :  { %vm114_vm1 = vcmp.lt.f32.partialorder %v113_v34, 8388608.0  ;;  %v117_v46 = vand.u32 2147483647, %v116_v39  ;;  %v129_v47 = vand.u32 2147483647, %v55_v32  ;;  %v134_v51 = vand.u32 2147483648, %v55_v32 }
  0x22   :  { %v111_v48 = vor.u32 %v110_v37, %v109_v42  ;;  %v125_v49 = vand.u32 2147483647, %v124_v43  ;;  %v132_v50 = vcvt.s32.f32 %v131_v45  ;;  %vm122_vm2 = vcmp.lt.f32.partialorder %v121_v41, 8388608.0  ;;  %s88_s18 = sshll.u32 %s208_s1, 4  ;;  %s89_s18 = int_to_ptr.vmem [resolvable:$true] %s88_s18 }
  0x23   :  { %v119_v52 = vor.u32 %v118_v40, %v117_v46  ;;  %vm130_vm3 = vcmp.lt.f32.partialorder %v129_v47, 8388608.0  ;;  %s180_s19 = scalar_lea.vmem %s89_s18, 512  ;;  %p185_p11 = scmp.lt.s32.totalorder %s89_s18, %s89_s18 }
  0x24   :  { %v112_v53 = vsel %vm106_vm0, %v111_v48, %v52_v27  ;;  %v127_v54 = vor.u32 %v126_v44, %v125_v49  ;;  %v133_v55 = vand.u32 2147483647, %v132_v50  ;;  %p181_p10 = scmp.ne.s32.totalorder %s89_s18, %s180_s19  ;;  %p186_p12 = scmp.lt.s32.totalorder %s180_s19, %s180_s19 }
  0x25   :  { %v60_v56 = vmul.f32 0.4, %v112_v53  ;;  %v120_v57 = vsel %vm114_vm1, %v119_v52, %v53_v28 }
  0x26   :  { %v61_v58 = vmul.f32 0.4, %v120_v57  ;;  %v128_v59 = vsel %vm122_vm2, %v127_v54, %v54_v29  ;;  %v135_v60 = vor.u32 %v134_v51, %v133_v55  ;;  %p187_p13 = por %p186_p12, %p185_p11 }
  0x27   :  { %68 = vst [vmem:[#allocation6] sm:$0x3f] %v60_v56  ;;  %v62_v61 = vmul.f32 0.4, %v128_v59 }
  0x28   :  { %69 = vst [vmem:[#allocation6 + $0x8] sm:$0x3f] %v61_v58  ;;  %v136_v62 = vsel %vm130_vm3, %v135_v60, %v55_v32  ;;  %p188_p0 = pnand %p187_p13, %p181_p10 }
  0x29   :  { %70 = vst [vmem:[#allocation6 + $0x10] sm:$0x3f] %v62_v61  ;;  %v63_v63 = vmul.f32 0.4, %v136_v62 }
  0x2b   :  { %71 = vst [vmem:[#allocation6 + $0x18] sm:$0x3f] %v63_v63 }
  0x2c   :  { %191 = shalt.err (!%p188_p0)
}
  0x2d   :  { %91 = dma.vmem_to_hbm [thread:$0]  %s89_s18, 512, %s235_s2, [#allocation7]  }
  0x2e   :  { %202 = dma.done.wait [#allocation4], 512  }
  0x2f   :  { %203 = vsyncadd [#allocation4], 4294966784 }
  0x30   :  { %204 = dma.done.wait [#allocation7], 512  }
  0x31   :  { %205 = vsyncadd [#allocation7], 4294966784 }
  0x32   :  { %98 = vsyncpa [#allocation3], 1 }
  0x33   :  { %99 = vsyncpa [#allocation4], 1 }
  0x34   :  { %100 = vsyncpa [#allocation7], 1 }

</bundles_post_ra>
